<compile_context>
chip_gen: v7x
topology: tpu7x:2x2x1
jax: 0.10.0
libtpu: 0.0.40
codegen_flags: <defaults>
</compile_context>

<pallas_src>
import jax
import jax.numpy as jnp
from jax import lax
from jax.experimental import pallas as pl
from jax.experimental.pallas import tpu as pltpu

HIDDEN1 = 128
HIDDEN2 = 64


def _round_up(x, m):
    return ((x + m - 1) // m) * m


def qnetwork_kernel(x_ref, w1_ref, b1_ref, w2_ref, b2_ref, w3t_ref, b3t_ref, out_ref):
    """One batch tile of the fused 3-layer MLP (output stored transposed).

    x:   (TB, S)            w1:  (S, 128)  bf16    b1:  (1, 128)   f32
    h1:  (TB, 128) f32      w2:  (128, 64) bf16    b2:  (1, 64)    f32
    h2:  (TB, 64)  f32      w3t: (A_pad, 64) bf16  b3t: (A_pad, 1) f32
    out: (A_pad, TB) f32    (rows A..A_pad-1 of w3t/b3t are zero)
    """
    # fc1 + ReLU: bf16 MXU inputs, f32 accumulation / elementwise.
    x = x_ref[...].astype(jnp.bfloat16)
    h1 = jnp.dot(x, w1_ref[...], preferred_element_type=jnp.float32) + b1_ref[...]
    h1 = jnp.maximum(h1, 0.0)

    # fc2 + ReLU
    h2 = jnp.dot(h1.astype(jnp.bfloat16), w2_ref[...],
                 preferred_element_type=jnp.float32) + b2_ref[...]
    h2 = jnp.maximum(h2, 0.0)

    # fc3 in transposed orientation: (A_pad, 64) contracted with (TB, 64) on the
    # feature axis -> (A_pad, TB).  Lane dim of the output block is TB (lane-dense,
    # unmasked vst); only 8 sublanes of f32 are written back per tile.
    y_t = lax.dot_general(w3t_ref[...], h2.astype(jnp.bfloat16),
                          (((1,), (1,)), ((), ())),
                          preferred_element_type=jnp.float32)
    out_ref[...] = (y_t + b3t_ref[...]).astype(out_ref.dtype)


def prepare_params(params):
    """One-time conversion of nn.Linear-style params into kernel-ready layout.

    Hoists the pad / transpose / bf16 casts out of the per-forward call path.
    """
    w1, b1, w2, b2, w3, b3 = params
    a = w3.shape[1]
    a_pad = _round_up(a, 8)  # sublane-pad the action dim
    return {
        "w1": w1.astype(jnp.bfloat16),                     # (S, 128)
        "b1": jnp.reshape(b1, (1, HIDDEN1)).astype(jnp.float32),
        "w2": w2.astype(jnp.bfloat16),                     # (128, 64)
        "b2": jnp.reshape(b2, (1, HIDDEN2)).astype(jnp.float32),
        "w3t": jnp.pad(w3.T, ((0, a_pad - a), (0, 0))).astype(jnp.bfloat16),   # (A_pad, 64)
        "b3t": jnp.pad(jnp.reshape(b3, (a, 1)),
                       ((0, a_pad - a), (0, 0))).astype(jnp.float32),          # (A_pad, 1)
        "action_size": a,
    }


def qnetwork_forward(state, prepared, *, tile_b=2048):
    """state: (B, state_size) f32 (or bf16) -> (B, action_size) f32."""
    B, S = state.shape
    a = prepared["action_size"]
    a_pad = prepared["w3t"].shape[0]

    # Batch tiling: TB must be a multiple of 128 (it is the lane dim of the
    # transposed output block).  Choose the step count first so batch padding
    # stays < 128 rows per step; use >= 2 steps for moderately sized batches so
    # both v7x TensorCores get work via the "parallel" grid axis.
    tile_b = max(128, _round_up(tile_b, 128))
    n_steps = pl.cdiv(B, tile_b)
    if n_steps == 1 and B >= 256:
        n_steps = 2
    TB = _round_up(pl.cdiv(B, n_steps), 128)
    Bp = TB * n_steps

    xp = state if Bp == B else jnp.pad(state, ((0, Bp - B), (0, 0)))

    out_t = pl.pallas_call(
        qnetwork_kernel,
        out_shape=jax.ShapeDtypeStruct((a_pad, Bp), jnp.float32),
        grid=(n_steps,),
        in_specs=[
            pl.BlockSpec((TB, S), lambda i: (i, 0)),            # x tile (pipelined)
            pl.BlockSpec((S, HIDDEN1), lambda i: (0, 0)),       # weights: VMEM-resident
            pl.BlockSpec((1, HIDDEN1), lambda i: (0, 0)),
            pl.BlockSpec((HIDDEN1, HIDDEN2), lambda i: (0, 0)),
            pl.BlockSpec((1, HIDDEN2), lambda i: (0, 0)),
            pl.BlockSpec((a_pad, HIDDEN2), lambda i: (0, 0)),
            pl.BlockSpec((a_pad, 1), lambda i: (0, 0)),
        ],
        out_specs=pl.BlockSpec((a_pad, TB), lambda i: (0, i)),
        compiler_params=pltpu.CompilerParams(
            dimension_semantics=("parallel",),
            vmem_limit_bytes=32 * 1024 * 1024,   # covers larger tiles on v5e's 16 MiB default
        ),
    )(xp, prepared["w1"], prepared["b1"], prepared["w2"], prepared["b2"],
      prepared["w3t"], prepared["b3t"])

    # (A_pad, Bp) -> (B, A): tiny slice + transpose over A*B elements.
    return out_t[:a, :B].T


def init_params(key, state_size, action_size):
    """Deterministic init mimicking nn.Linear's U(-1/sqrt(fan_in), +1/sqrt(fan_in))."""
    def linear(key, fan_in, fan_out):
        kw, kb = jax.random.split(key)
        bound = 1.0 / jnp.sqrt(jnp.float32(fan_in))
        w = jax.random.uniform(kw, (fan_in, fan_out), jnp.float32, -bound, bound)
        b = jax.random.uniform(kb, (1, fan_out), jnp.float32, -bound, bound)
        return w, b

    k1, k2, k3 = jax.random.split(key, 3)
    w1, b1 = linear(k1, state_size, HIDDEN1)
    w2, b2 = linear(k2, HIDDEN1, HIDDEN2)
    w3, b3 = linear(k3, HIDDEN2, action_size)
    return (w1, b1, w2, b2, w3, b3)


def qnetwork_reference_bf16(state, params):
    """Pure-JAX reference with the same bf16-MXU / f32-accumulate dtype discipline."""
    w1, b1, w2, b2, w3, b3 = params
    bf = jnp.bfloat16
    h1 = jnp.maximum(jnp.dot(state.astype(bf), w1.astype(bf),
                             preferred_element_type=jnp.float32) + b1, 0.0)
    h2 = jnp.maximum(jnp.dot(h1.astype(bf), w2.astype(bf),
                             preferred_element_type=jnp.float32) + b2, 0.0)
    return jnp.dot(h2.astype(bf), w3.astype(bf),
                   preferred_element_type=jnp.float32) + b3


def qnetwork_reference_f32(state, params):
    """Full-f32 reference (loose sanity check vs bf16 MXU path)."""
    w1, b1, w2, b2, w3, b3 = params
    h1 = jnp.maximum(state @ w1 + b1, 0.0)
    h2 = jnp.maximum(h1 @ w2 + b2, 0.0)
    return h2 @ w3 + b3


if __name__ == "__main__":
    key = jax.random.PRNGKey(0)
    k_params, k_state1, k_state2 = jax.random.split(key, 3)

    state_size = 8
    action_size = 4
    raw_params = init_params(k_params, state_size, action_size)
    prepared = prepare_params(raw_params)   # one-time weight prep (hoisted out of forward)

    # Case 1: tiny online-acting batch (single grid step).
    state_small = jax.random.normal(k_state1, (8, state_size), jnp.float32)
    out_small = jax.block_until_ready(qnetwork_forward(state_small, prepared))
    assert out_small.shape == (8, action_size)
    ref_small = qnetwork_reference_bf16(state_small, raw_params)
    assert jnp.allclose(out_small, ref_small, atol=1e-4, rtol=1e-4), "mismatch (small) vs bf16 ref"
    assert jnp.allclose(out_small, qnetwork_reference_f32(state_small, raw_params),
                        atol=5e-2, rtol=5e-2), "mismatch (small) vs f32 ref"

    # Case 2: ragged batch with a small tile -> multi-step (megacore-parallel) grid + padding.
    B2 = 300
    state_big = jax.random.normal(k_state2, (B2, state_size), jnp.float32)
    out_big = jax.block_until_ready(qnetwork_forward(state_big, prepared, tile_b=128))
    assert out_big.shape == (B2, action_size)
    ref_big = qnetwork_reference_bf16(state_big, raw_params)
    assert jnp.allclose(out_big, ref_big, atol=1e-4, rtol=1e-4), "mismatch (big) vs bf16 ref"

    print("KERNEL_OK")
</pallas_src>

<mosaic_0001>
module attributes {stable_mosaic.version = 11 : i64} {
  func.func @qnetwork_kernel(%arg0: i32, %arg1: memref<128x8xf32, #tpu.memory_space<vmem>>, %arg2: memref<8x128xbf16, #tpu.memory_space<vmem>>, %arg3: memref<1x128xf32, #tpu.memory_space<vmem>>, %arg4: memref<128x64xbf16, #tpu.memory_space<vmem>>, %arg5: memref<1x64xf32, #tpu.memory_space<vmem>>, %arg6: memref<8x64xbf16, #tpu.memory_space<vmem>>, %arg7: memref<8x1xf32, #tpu.memory_space<vmem>>, %arg8: memref<8x128xf32, #tpu.memory_space<vmem>>) attributes {dimension_semantics = [#tpu.dimension_semantics<parallel>], iteration_bounds = array<i64: 1>, scalar_prefetch = 0 : i64, scratch_operands = 0 : i64, tpu.core_type = #tpu.core_type<tc>, window_params = [{transform_indices = @transform_0, window_bounds = array<i64: 128, 8>}, {pipeline_mode = #tpu.pipeline_mode<synchronous>, transform_indices = @transform_1, window_bounds = array<i64: 8, 128>}, {pipeline_mode = #tpu.pipeline_mode<synchronous>, transform_indices = @transform_2, window_bounds = array<i64: 1, 128>}, {pipeline_mode = #tpu.pipeline_mode<synchronous>, transform_indices = @transform_3, window_bounds = array<i64: 128, 64>}, {pipeline_mode = #tpu.pipeline_mode<synchronous>, transform_indices = @transform_4, window_bounds = array<i64: 1, 64>}, {pipeline_mode = #tpu.pipeline_mode<synchronous>, transform_indices = @transform_5, window_bounds = array<i64: 8, 64>}, {pipeline_mode = #tpu.pipeline_mode<synchronous>, transform_indices = @transform_6, window_bounds = array<i64: 8, 1>}, {transform_indices = @transform_7, window_bounds = array<i64: 8, 128>}]} {
    %c0 = arith.constant 0 : index
    %c0_0 = arith.constant 0 : index
    %0 = vector.load %arg1[%c0, %c0_0] : memref<128x8xf32, #tpu.memory_space<vmem>>, vector<128x8xf32>
    %1 = arith.truncf %0 : vector<128x8xf32> to vector<128x8xbf16>
    %c0_1 = arith.constant 0 : index
    %c0_2 = arith.constant 0 : index
    %2 = vector.load %arg2[%c0_1, %c0_2] : memref<8x128xbf16, #tpu.memory_space<vmem>>, vector<8x128xbf16>
    %cst = arith.constant dense<0.000000e+00> : vector<128x128xf32>
    %3 = tpu.matmul %1, %2, %cst {dimension_numbers = #tpu.dot_dimension_numbers<[1], [0], [0], [1], [0, 0, 1, 1], [], []>} : vector<128x8xbf16>, vector<8x128xbf16>, vector<128x128xf32> -> vector<128x128xf32>
    %c0_3 = arith.constant 0 : index
    %c0_4 = arith.constant 0 : index
    %4 = vector.load %arg3[%c0_3, %c0_4] : memref<1x128xf32, #tpu.memory_space<vmem>>, vector<1x128xf32>
    %5 = vector.broadcast %4 : vector<1x128xf32> to vector<128x128xf32>
    %6 = arith.addf %3, %5 : vector<128x128xf32>
    %cst_5 = arith.constant 0.000000e+00 : f32
    %7 = vector.broadcast %cst_5 : f32 to vector<128x128xf32>
    %8 = arith.maximumf %6, %7 : vector<128x128xf32>
    %9 = arith.truncf %8 : vector<128x128xf32> to vector<128x128xbf16>
    %c0_6 = arith.constant 0 : index
    %c0_7 = arith.constant 0 : index
    %10 = vector.load %arg4[%c0_6, %c0_7] : memref<128x64xbf16, #tpu.memory_space<vmem>>, vector<128x64xbf16>
    %cst_8 = arith.constant dense<0.000000e+00> : vector<128x64xf32>
    %11 = tpu.matmul %9, %10, %cst_8 {dimension_numbers = #tpu.dot_dimension_numbers<[1], [0], [0], [1], [0, 0, 1, 1], [], []>} : vector<128x128xbf16>, vector<128x64xbf16>, vector<128x64xf32> -> vector<128x64xf32>
    %c0_9 = arith.constant 0 : index
    %c0_10 = arith.constant 0 : index
    %12 = vector.load %arg5[%c0_9, %c0_10] : memref<1x64xf32, #tpu.memory_space<vmem>>, vector<1x64xf32>
    %13 = vector.broadcast %12 : vector<1x64xf32> to vector<128x64xf32>
    %14 = arith.addf %11, %13 : vector<128x64xf32>
    %cst_11 = arith.constant 0.000000e+00 : f32
    %15 = vector.broadcast %cst_11 : f32 to vector<128x64xf32>
    %16 = arith.maximumf %14, %15 : vector<128x64xf32>
    %c0_12 = arith.constant 0 : index
    %c0_13 = arith.constant 0 : index
    %17 = vector.load %arg6[%c0_12, %c0_13] : memref<8x64xbf16, #tpu.memory_space<vmem>>, vector<8x64xbf16>
    %18 = arith.truncf %16 : vector<128x64xf32> to vector<128x64xbf16>
    %cst_14 = arith.constant dense<0.000000e+00> : vector<8x128xf32>
    %19 = tpu.matmul %17, %18, %cst_14 {dimension_numbers = #tpu.dot_dimension_numbers<[1], [1], [0], [0], [0, 0, 1, 0], [], []>} : vector<8x64xbf16>, vector<128x64xbf16>, vector<8x128xf32> -> vector<8x128xf32>
    %c0_15 = arith.constant 0 : index
    %c0_16 = arith.constant 0 : index
    %20 = vector.load %arg7[%c0_15, %c0_16] : memref<8x1xf32, #tpu.memory_space<vmem>>, vector<8x1xf32>
    %21 = vector.broadcast %20 : vector<8x1xf32> to vector<8x128xf32>
    %22 = arith.addf %19, %21 : vector<8x128xf32>
    %c0_17 = arith.constant 0 : index
    %c0_18 = arith.constant 0 : index
    %23 = vector.load %arg8[%c0_17, %c0_18] : memref<8x128xf32, #tpu.memory_space<vmem>>, vector<8x128xf32>
    tpu.vector_store %arg8[%c0_17, %c0_18], %22 {strides = array<i32>} : memref<8x128xf32, #tpu.memory_space<vmem>>, vector<8x128xf32>,
    return
  }
  func.func @transform_0(%arg0: i32) -> (i32, i32) {
    %c0_i32 = arith.constant 0 : i32
    %c0_i32_0 = arith.constant 0 : i32
    return %arg0, %c0_i32 : i32, i32
  }
  func.func @transform_1(%arg0: i32) -> (i32, i32) {
    %c0_i32 = arith.constant 0 : i32
    %c0_i32_0 = arith.constant 0 : i32
    %c0_i32_1 = arith.constant 0 : i32
    return %c0_i32, %c0_i32_0 : i32, i32
  }
  func.func @transform_2(%arg0: i32) -> (i32, i32) {
    %c0_i32 = arith.constant 0 : i32
    %c0_i32_0 = arith.constant 0 : i32
    %c0_i32_1 = arith.constant 0 : i32
    return %c0_i32, %c0_i32_0 : i32, i32
  }
  func.func @transform_3(%arg0: i32) -> (i32, i32) {
    %c0_i32 = arith.constant 0 : i32
    %c0_i32_0 = arith.constant 0 : i32
    %c0_i32_1 = arith.constant 0 : i32
    return %c0_i32, %c0_i32_0 : i32, i32
  }
  func.func @transform_4(%arg0: i32) -> (i32, i32) {
    %c0_i32 = arith.constant 0 : i32
    %c0_i32_0 = arith.constant 0 : i32
    %c0_i32_1 = arith.constant 0 : i32
    return %c0_i32, %c0_i32_0 : i32, i32
  }
  func.func @transform_5(%arg0: i32) -> (i32, i32) {
    %c0_i32 = arith.constant 0 : i32
    %c0_i32_0 = arith.constant 0 : i32
    %c0_i32_1 = arith.constant 0 : i32
    return %c0_i32, %c0_i32_0 : i32, i32
  }
  func.func @transform_6(%arg0: i32) -> (i32, i32) {
    %c0_i32 = arith.constant 0 : i32
    %c0_i32_0 = arith.constant 0 : i32
    %c0_i32_1 = arith.constant 0 : i32
    return %c0_i32, %c0_i32_0 : i32, i32
  }
  func.func @transform_7(%arg0: i32) -> (i32, i32) {
    %c0_i32 = arith.constant 0 : i32
    %c0_i32_0 = arith.constant 0 : i32
    return %c0_i32, %arg0 : i32, i32
  }
}

</mosaic_0001>

<bundles_post_ra>
// kernel: tpu_custom_call.1
= control target key start
LH: loop header
LB: loop body
LE: loop exit
PB: predicated region body
PF: predicated region fallthrough
CT: control target
= control target key end

     0   :  { %vm85_vm0 = vcmask 1043456   ;;  %vm60_vm1 = vcmask 64512   ;;  %s822_s0 = inlined_call_operand.vmem [shape: f32[128,8], index: 0, kind: input, shape index: {}]   ;;  %s823_s1 = inlined_call_operand.vmem [shape: bf16[8,128], index: 1, kind: input, shape index: {}]   ;;  %s824_s2 = inlined_call_operand.vmem [shape: f32[1,128], index: 2, kind: input, shape index: {}]   ;;  %s825_s3 = inlined_call_operand.vmem [shape: bf16[128,64], index: 3, kind: input, shape index: {}]   ;;  %s826_s4 = inlined_call_operand.vmem [shape: f32[1,64], index: 4, kind: input, shape index: {}]   ;;  %s827_s5 = inlined_call_operand.vmem [shape: bf16[8,64], index: 5, kind: input, shape index: {}]   ;;  %s828_s6 = inlined_call_operand.vmem [shape: f32[8,1], index: 6, kind: input, shape index: {}]   ;;  %s829_s7 = inlined_call_operand.hbm [shape: f32[8,128], index: 7, kind: output, shape index: {}]  }
   0x1   :  { %v52_v0 = vld [vmem:[%s823_s1] sm:$0xf]  ;;  %v29_v2 = vld [vmem:[%s822_s0 + $0x8] sm:$0xff]  ;;  %v30_v5 = vld [vmem:[%s822_s0 + $0x10] sm:$0xff] }
   0x2   :  { %v28_v1 = vld [vmem:[%s822_s0] sm:$0xff]  ;;  %615 = vmatprep.subr.msk.bf16.mxu1 %vm85_vm0, %v52_v0  ;;  %v87_v3 = vsel %vm85_vm0, %v52_v0, 0  ;;  %v31_v6 = vld [vmem:[%s822_s0 + $0x18] sm:$0xff]  ;;  %v33_v9 = vld [vmem:[%s822_s0 + $0x28] sm:$0xff] }
   0x3   :  { %v44_v4 = vpack.c.bf16 %v29_v2, %v28_v1  ;;  %v32_v7 = vld [vmem:[%s822_s0 + $0x20] sm:$0xff]  ;;  %546 = vmatpush3.bf16.msra.mxu1 %v87_v3  ;;  %v45_v8 = vpack.c.bf16 %v31_v6, %v30_v5  ;;  %v34_v11 = vld [vmem:[%s822_s0 + $0x30] sm:$0xff]  ;;  %v35_v12 = vld [vmem:[%s822_s0 + $0x38] sm:$0xff] }
   0x4   :  { %v46_v10 = vpack.c.bf16 %v33_v9, %v32_v7  ;;  %v36_v13 = vld [vmem:[%s822_s0 + $0x40] sm:$0xff]  ;;  %v37_v14 = vld [vmem:[%s822_s0 + $0x48] sm:$0xff]  ;;  %v47_v17 = vpack.c.bf16 %v35_v12, %v34_v11  ;;  %v623_v19 = vld [vmem:[%s825_s3 + $0x10] sm:$0xff]  }
   0x5   :  { %547 = vmatprep.mubr.msk.bf16.mxu1 %vm60_vm1, %v44_v4  ;;  %v621_v15 = vld [vmem:[%s825_s3] sm:$0xff]   ;;  %v622_v16 = vld [vmem:[%s825_s3 + $0x8] sm:$0xff]   ;;  %v48_v18 = vpack.c.bf16 %v37_v14, %v36_v13 }
   0x6   :  { %548 = vmatmul.mubr.msk.bf16.vlgmr.msra.gmra.mrb[0].mxu1 %vm60_vm1, %v45_v8  ;;  %563 = vmatprep.subr.bf16.mxu1 %v621_v15 }
   0x7   :  { %551 = vmatprep.mubr.msk.bf16.mxu1 %vm60_vm1, %v46_v10  ;;  %564 = vmatpush3.bf16.msra.mxu1 %v621_v15 }
   0x8   :  { %565 = vmatprep.subr.bf16.mxu1 %v622_v16 }
   0xe   :  { %552 = vmatmul.mubr.msk.bf16.gmra.mrb[4].mxu1 %vm60_vm1, %v47_v17 }
   0xf   :  { %12 = vsyncpa [#allocation3], 0  ;;  %555 = vmatprep.mubr.msk.bf16.mxu1 %vm60_vm1, %v48_v18  ;;  %v38_v20 = vld [vmem:[%s822_s0 + $0x50] sm:$0xff]  ;;  %v39_v21 = vld [vmem:[%s822_s0 + $0x58] sm:$0xff]  ;;  %566 = vmatpush3.bf16.msra.mxu1 %v622_v16  ;;  %vm654_vm2 = vmmov 0   ;;  %vm409_vm3 = vcmask 523264  }
  0x10   :  { %v40_v22 = vld [vmem:[%s822_s0 + $0x60] sm:$0xff]  ;;  %v41_v23 = vld [vmem:[%s822_s0 + $0x68] sm:$0xff]  ;;  %567 = vmatprep.subr.bf16.mxu1 %v623_v19  ;;  %v624_v24 = vld [vmem:[%s825_s3 + $0x18] sm:$0xff]   ;;  %v49_v25 = vpack.c.bf16 %v39_v21, %v38_v20  ;;  %s656_s29 = smov [#allocation2]  }
  0x11   :  { %v50_v26 = vpack.c.bf16 %v41_v23, %v40_v22  ;;  %v625_v27 = vld [vmem:[%s825_s3 + $0x20] sm:$0xff]   ;;  %v42_v28 = vld [vmem:[%s822_s0 + $0x70] sm:$0xff]  ;;  %v43_v29 = vld [vmem:[%s822_s0 + $0x78] sm:$0xff]  ;;  %s484_s30 = sshll.u32 %s656_s29, 4  ;;  %s485_s30 = int_to_ptr.vmem [resolvable:$true] %s484_s30 }
  0x12   :  { %v626_v30 = vld [vmem:[%s825_s3 + $0x28] sm:$0xff]   ;;  %v51_v31 = vpack.c.bf16 %v43_v29, %v42_v28  ;;  %v627_v32 = vld [vmem:[%s825_s3 + $0x30] sm:$0xff]   ;;  %v628_v33 = vld [vmem:[%s825_s3 + $0x38] sm:$0xff]   ;;  %v655_v29 = vmov 0   ;;  %s629_s8 = scalar_lea.vmem %s485_s30, 128  ;;  %p634_p1 = scmp.lt.s32.totalorder %s485_s30, %s485_s30 }
  0x13   :  { %568 = vmatpush3.bf16.msra.mxu1 %v623_v19  ;;  %v492_v34 = vld [vmem:[%s824_s2] ss:$0 sm:$0xff]  ;;  %620 = vset.pattern.permute.xlu0 %v655_v29  ;;  %p630_p0 = scmp.ne.s32.totalorder %s485_s30, %s629_s8  ;;  %p635_p2 = scmp.lt.s32.totalorder %s629_s8, %s629_s8 }
  0x14   :  { %569 = vmatprep.subr.bf16.mxu1 %v624_v24  ;;  %v403_v28 = vld [vmem:[%s828_s6] sm:$0xff] }
  0x15   :  { %406 = vperm.xlu0 %620, %v403_v28   ;;  %p636_p3 = por %p635_p2, %p634_p1 }
  0x16   :  { %556 = vmatmul.mubr.msk.bf16.gmra.mrb[8].mxu1 %vm60_vm1, %v49_v25 }
  0x17   :  { %559 = vmatprep.mubr.msk.bf16.mxu1 %vm60_vm1, %v50_v26  ;;  %570 = vmatpush3.bf16.msra.mxu1 %v624_v24  ;;  %p637_p4 = pnand %p636_p3, %p630_p0 }
  0x18   :  { %571 = vmatprep.subr.bf16.mxu1 %v625_v27 }
  0x1b   :  { %572 = vmatpush3.bf16.msra.mxu1 %v625_v27  ;;  %v653_v27 = vmov 0.0  }
  0x1c   :  { %573 = vmatprep.subr.bf16.mxu1 %v626_v30  ;;  %595 = vmatprep.subr.bf16.mxu0 %v653_v27 }
  0x1d   :  { %611 = vmatprep.mubr.msk.bf16.mxu0 %vm654_vm2, %v653_v27 }
  0x1e   :  { %560 = vmatmul.mubr.msk.bf16.gmra.mrb[12].mxu1 %vm60_vm1, %v51_v31 }
  0x1f   :  { %574 = vmatpush3.bf16.msra.mxu1 %v626_v30  ;;  %v501_v30 = vld [vmem:[%s826_s4] ss:$0 sm:$0xff] }
  0x20   :  { %575 = vmatprep.subr.bf16.mxu1 %v627_v32 }
  0x23   :  { %576 = vmatpush3.bf16.msra.mxu1 %v627_v32 }
  0x24   :  { %577 = vmatprep.subr.bf16.mxu1 %v628_v33 }
  0x27   :  { %578 = vmatpush3.bf16.msra.mxu1 %v628_v33 }
  0xd9   :  { %v549_v35 = vpop.f32.mrb[0].mxu1 }
  0xda   :  { %v132_v36 = vadd.f32 %v549_v35, %v492_v34  ;;  %v123_v37 = vpop.f32.mrb[1].mxu1 }
  0xdb   :  { %v124_v38 = vadd.f32 %v492_v34, %v123_v37  ;;  %v550_v39 = vpop.f32.mrb[2].mxu1 }
  0xdc   :  { %v135_v40 = vadd.f32 %v550_v39, %v492_v34  ;;  %v126_v41 = vpop.f32.mrb[3].mxu1  ;;  %v188_v43 = vmax.f32 %v132_v36, 0.0 }
  0xdd   :  { %v127_v42 = vadd.f32 %v492_v34, %v126_v41  ;;  %v186_v45 = vmax.f32 %v124_v38, 0.0 }
  0xde   :  { %v189_v44 = vmax.f32 %v135_v40, 0.0 }
  0xdf   :  { %v187_v46 = vmax.f32 %v127_v42, 0.0 }
  0xe0   :  { %v203_v47 = vpack.c.bf16 %v189_v44, %v188_v43 }
  0xe1   :  { %v202_v48 = vpack.c.bf16 %v187_v46, %v186_v45  ;;  %v553_v49 = vpop.f32.mrb[4].mxu1 }
  0xe2   :  { %v148_v50 = vadd.f32 %v553_v49, %v492_v34  ;;  %v139_v51 = vpop.f32.mrb[5].mxu1 }
  0xe3   :  { %v140_v52 = vadd.f32 %v492_v34, %v139_v51  ;;  %579 = vmatprep.mubr.bf16.mxu1 %v202_v48  ;;  %v554_v53 = vpop.f32.mrb[6].mxu1 }
  0xe4   :  { %v192_v54 = vmax.f32 %v148_v50, 0.0  ;;  %v151_v55 = vadd.f32 %v554_v53, %v492_v34  ;;  %580 = vmatmul.mubr.bf16.vlgmr.msra.gmra.mrb[16].mxu1 %v203_v47  ;;  %v142_v56 = vpop.f32.mrb[7].mxu1 }
  0xe5   :  { %v190_v57 = vmax.f32 %v140_v52, 0.0  ;;  %v143_v58 = vadd.f32 %v492_v34, %v142_v56 }
  0xe6   :  { %v193_v59 = vmax.f32 %v151_v55, 0.0 }
  0xe7   :  { %v191_v60 = vmax.f32 %v143_v58, 0.0 }
  0xe8   :  { %v205_v61 = vpack.c.bf16 %v193_v59, %v192_v54 }
  0xe9   :  { %v204_v62 = vpack.c.bf16 %v191_v60, %v190_v57  ;;  %v557_v63 = vpop.f32.mrb[8].mxu1 }
  0xea   :  { %v164_v0 = vadd.f32 %v557_v63, %v492_v34  ;;  %v155_v1 = vpop.f32.mrb[9].mxu1 }
  0xeb   :  { %583 = vmatprep.mubr.bf16.mxu1 %v204_v62  ;;  %v156_v2 = vadd.f32 %v492_v34, %v155_v1  ;;  %v558_v3 = vpop.f32.mrb[10].mxu1 }
  0xec   :  { %584 = vmatmul.mubr.bf16.gmra.mrb[20].mxu1 %v205_v61  ;;  %v196_v4 = vmax.f32 %v164_v0, 0.0  ;;  %v167_v5 = vadd.f32 %v558_v3, %v492_v34  ;;  %v158_v6 = vpop.f32.mrb[11].mxu1 }
  0xed   :  { %v194_v7 = vmax.f32 %v156_v2, 0.0  ;;  %v159_v8 = vadd.f32 %v492_v34, %v158_v6 }
  0xee   :  { %v197_v9 = vmax.f32 %v167_v5, 0.0 }
  0xef   :  { %v195_v10 = vmax.f32 %v159_v8, 0.0 }
  0xf0   :  { %v207_v11 = vpack.c.bf16 %v197_v9, %v196_v4 }
  0xf1   :  { %v206_v12 = vpack.c.bf16 %v195_v10, %v194_v7  ;;  %v561_v13 = vpop.f32.mrb[12].mxu1 }
  0xf2   :  { %v180_v14 = vadd.f32 %v561_v13, %v492_v34  ;;  %v171_v15 = vpop.f32.mrb[13].mxu1 }
  0xf3   :  { %587 = vmatprep.mubr.bf16.mxu1 %v206_v12  ;;  %v172_v16 = vadd.f32 %v492_v34, %v171_v15  ;;  %v562_v17 = vpop.f32.mrb[14].mxu1 }
  0xf4   :  { %588 = vmatmul.mubr.bf16.gmra.mrb[24].mxu1 %v207_v11  ;;  %v200_v18 = vmax.f32 %v180_v14, 0.0  ;;  %v183_v19 = vadd.f32 %v562_v17, %v492_v34  ;;  %v174_v20 = vpop.f32.mrb[15].mxu1 }
  0xf5   :  { %v198_v21 = vmax.f32 %v172_v16, 0.0  ;;  %v175_v22 = vadd.f32 %v492_v34, %v174_v20 }
  0xf6   :  { %v201_v23 = vmax.f32 %v183_v19, 0.0 }
  0xf7   :  { %v199_v24 = vmax.f32 %v175_v22, 0.0 }
  0xf8   :  { %v209_v25 = vpack.c.bf16 %v201_v23, %v200_v18 }
  0xf9   :  { %v208_v26 = vpack.c.bf16 %v199_v24, %v198_v21 }
  0xfb   :  { %591 = vmatprep.mubr.bf16.mxu1 %v208_v26 }
  0xfc   :  { %592 = vmatmul.mubr.bf16.gmra.mrb[28].mxu1 %v209_v25 }
 0x1b7   :  { %v581_v31 = vpop.f32.mrb[16].mxu1 }
 0x1b8   :  { %v324_v32 = vadd.f32 %v581_v31, %v501_v30  ;;  %v315_v33 = vpop.f32.mrb[17].mxu1 }
 0x1b9   :  { %v316_v34 = vadd.f32 %v501_v30, %v315_v33  ;;  %v582_v35 = vpop.f32.mrb[18].mxu1  ;;  %v407_v33 = vpop.permute.xlu0 %406 }
 0x1ba   :  { %v327_v36 = vadd.f32 %v582_v35, %v501_v30  ;;  %v318_v37 = vpop.f32.mrb[19].mxu1  ;;  %v380_v39 = vmax.f32 %v324_v32, 0.0  ;;  %v394_v32 = vld [vmem:[%s827_s5] sm:$0xf] }
 0x1bb   :  { %v319_v38 = vadd.f32 %v501_v30, %v318_v37  ;;  %v378_v41 = vmax.f32 %v316_v34, 0.0 }
 0x1bc   :  { %v381_v40 = vmax.f32 %v327_v36, 0.0 }
 0x1bd   :  { %v379_v42 = vmax.f32 %v319_v38, 0.0 }
 0x1be   :  { %v396_v43 = vpack.c.bf16 %v381_v40, %v380_v39 }
 0x1bf   :  { %v585_v44 = vpop.f32.mrb[20].mxu1  ;;  %v395_v45 = vpack.c.bf16 %v379_v42, %v378_v41 }
 0x1c0   :  { %v340_v46 = vadd.f32 %v585_v44, %v501_v30  ;;  %v331_v47 = vpop.f32.mrb[21].mxu1  ;;  %v417_v63 = vsel %vm409_vm3, %v396_v43, 0 }
 0x1c1   :  { %v332_v48 = vadd.f32 %v501_v30, %v331_v47  ;;  %v586_v49 = vpop.f32.mrb[22].mxu1  ;;  %v414_v50 = vsel %vm409_vm3, %v395_v45, 0 }
 0x1c2   :  { %v384_v51 = vmax.f32 %v340_v46, 0.0  ;;  %v343_v52 = vadd.f32 %v586_v49, %v501_v30  ;;  %596 = vmatpush3.bf16.xpose.msra.mxu0 %v414_v50  ;;  %v334_v53 = vpop.f32.mrb[23].mxu1 }
 0x1c3   :  { %v382_v54 = vmax.f32 %v332_v48, 0.0  ;;  %v335_v55 = vadd.f32 %v501_v30, %v334_v53  ;;  %597 = vmatprep.subr.bf16.mxu0 %v653_v27 }
 0x1c4   :  { %v385_v56 = vmax.f32 %v343_v52, 0.0 }
 0x1c5   :  { %v383_v57 = vmax.f32 %v335_v55, 0.0 }
 0x1c6   :  { %v398_v58 = vpack.c.bf16 %v385_v56, %v384_v51 }
 0x1c7   :  { %v397_v59 = vpack.c.bf16 %v383_v57, %v382_v54  ;;  %v589_v60 = vpop.f32.mrb[24].mxu1 }
 0x1c8   :  { %v356_v61 = vadd.f32 %v589_v60, %v501_v30  ;;  %v347_v62 = vpop.f32.mrb[25].mxu1  ;;  %v423_v26 = vsel %vm409_vm3, %v398_v58, 0 }
 0x1c9   :  { %v348_v0 = vadd.f32 %v501_v30, %v347_v62  ;;  %v590_v1 = vpop.f32.mrb[26].mxu1  ;;  %v420_v14 = vsel %vm409_vm3, %v397_v59, 0 }
 0x1ca   :  { %598 = vmatpush3.bf16.xpose.msra.mxu0 %v417_v63  ;;  %v388_v2 = vmax.f32 %v356_v61, 0.0  ;;  %v359_v3 = vadd.f32 %v590_v1, %v501_v30  ;;  %v350_v4 = vpop.f32.mrb[27].mxu1 }
 0x1cb   :  { %v386_v5 = vmax.f32 %v348_v0, 0.0  ;;  %599 = vmatprep.subr.bf16.mxu0 %v653_v27  ;;  %v351_v6 = vadd.f32 %v501_v30, %v350_v4 }
 0x1cc   :  { %v389_v7 = vmax.f32 %v359_v3, 0.0 }
 0x1cd   :  { %v387_v8 = vmax.f32 %v351_v6, 0.0 }
 0x1ce   :  { %v400_v9 = vpack.c.bf16 %v389_v7, %v388_v2 }
 0x1cf   :  { %v399_v10 = vpack.c.bf16 %v387_v8, %v386_v5  ;;  %v593_v11 = vpop.f32.mrb[28].mxu1 }
 0x1d0   :  { %v372_v12 = vadd.f32 %v593_v11, %v501_v30  ;;  %v363_v13 = vpop.f32.mrb[29].mxu1  ;;  %v429_v29 = vsel %vm409_vm3, %v400_v9, 0 }
 0x1d1   :  { %v364_v15 = vadd.f32 %v501_v30, %v363_v13  ;;  %v594_v16 = vpop.f32.mrb[30].mxu1  ;;  %v426_v28 = vsel %vm409_vm3, %v399_v10, 0 }
 0x1d2   :  { %600 = vmatpush3.bf16.xpose.msra.mxu0 %v420_v14  ;;  %v392_v17 = vmax.f32 %v372_v12, 0.0  ;;  %v375_v18 = vadd.f32 %v594_v16, %v501_v30  ;;  %v366_v19 = vpop.f32.mrb[31].mxu1 }
 0x1d3   :  { %601 = vmatprep.subr.bf16.mxu0 %v653_v27  ;;  %v390_v20 = vmax.f32 %v364_v15, 0.0  ;;  %v367_v21 = vadd.f32 %v501_v30, %v366_v19 }
 0x1d4   :  { %v393_v22 = vmax.f32 %v375_v18, 0.0 }
 0x1d5   :  { %v391_v23 = vmax.f32 %v367_v21, 0.0 }
 0x1d6   :  { %v402_v24 = vpack.c.bf16 %v393_v22, %v392_v17 }
 0x1d7   :  { %v401_v25 = vpack.c.bf16 %v391_v23, %v390_v20 }
 0x1d8   :  { %v435_v31 = vsel %vm409_vm3, %v402_v24, 0 }
 0x1d9   :  { %v432_v30 = vsel %vm409_vm3, %v401_v25, 0 }
 0x1da   :  { %602 = vmatpush3.bf16.xpose.msra.mxu0 %v423_v26 }
 0x1db   :  { %603 = vmatprep.subr.bf16.mxu0 %v653_v27 }
 0x1e2   :  { %604 = vmatpush3.bf16.xpose.msra.mxu0 %v426_v28 }
 0x1e3   :  { %605 = vmatprep.subr.bf16.mxu0 %v653_v27 }
 0x1ea   :  { %606 = vmatpush3.bf16.xpose.msra.mxu0 %v429_v29 }
 0x1eb   :  { %607 = vmatprep.subr.bf16.mxu0 %v653_v27 }
 0x1f2   :  { %608 = vmatpush3.bf16.xpose.msra.mxu0 %v432_v30 }
 0x1f3   :  { %609 = vmatprep.subr.bf16.mxu0 %v653_v27 }
 0x1fa   :  { %610 = vmatpush3.bf16.xpose.msra.mxu0 %v435_v31 }
 0x201   :  { %612 = vmatmul.mubr.msk.bf16.vlgmr.msra.gmra.mrb[0].mxu0 %vm409_vm3, %v394_v32 }
 0x2d4   :  { %v471_v34 = vpop.f32.mrb[0].mxu0 }
 0x2d5   :  { %v472_v35 = vadd.f32 %v471_v34, %v407_v33  ;;  %v613_v36 = vpop.f32.mrb[1].mxu0 }
 0x2d6   :  { %v474_v37 = vpop.f32.mrb[2].mxu0 }
 0x2d7   :  { %477 = vst [vmem:[#allocation2] sm:$0xff] %v472_v35  ;;  %v614_v38 = vpop.f32.mrb[3].mxu0 }
 0x2d8   :  { %640 = shalt.err (!%p637_p4)
}
 0x2d9   :  { %s641_s10 = scalar_lea.hbm %s829_s7, 128 }
 0x2da   :  { %p642_p5 = scmp.ne.s32.totalorder %s829_s7, %s641_s10  ;;  %p645_p6 = scmp.lt.u32.totalorder %s641_s10, %s829_s7 }
 0x2dc   :  { %p647_p7 = pnand %p645_p6, %p642_p5 }
 0x2de   :  { %650 = shalt.err (!%p647_p7)
}
 0x2df   :  { %487 = dma.vmem_to_hbm [thread:$0]  %s485_s30, 128, %s829_s7, [#allocation3]  }
 0x2e0   :  { %651 = dma.done.wait [#allocation3], 128  }
 0x2e1   :  { %652 = vsyncadd [#allocation3], 4294967168 }
 0x2e2   :  { %491 = vsyncpa [#allocation3], 1 }

</bundles_post_ra>
